<compile_context>
chip_gen: v5e
topology: v5e:2x2
jax: 0.10.0
libtpu: 0.0.40
codegen_flags: <defaults>
</compile_context>

<pallas_src>
import functools

import jax
import jax.numpy as jnp
from jax.experimental import pallas as pl
from jax.experimental.pallas import tpu as pltpu


def _chebconv_kernel(coef_ref, feat_ref, anorm_ref, w_ref, b_ref, out_ref, *, k):
    """Per-graph ChebConv forward, everything resident in VMEM.

    coef_ref  : (B, 2)  SMEM scalars per graph: [2/lambda_max, 4/lambda_max]
    feat_ref  : (N, Din)      input node features of graph g
    anorm_ref : (N, N)        D^{-1/2} A D^{-1/2} of graph g (pre-folded)
    w_ref     : (K*Din, Dout) fused Chebyshev weights (vstack of W[0..K-1])
    b_ref     : (1, Dout)     bias
    out_ref   : (N, Dout)     output node features of graph g
    """
    g = pl.program_id(0)
    c2 = coef_ref[g, 0]          # 2 / lambda_max  (scalar unit, SMEM)
    c4 = coef_ref[g, 1]          # 4 / lambda_max

    tx0 = feat_ref[...]          # (N, Din), Z^{0} = H
    txs = [tx0]

    tx1 = tx0
    if k > 1:
        a = anorm_ref[...]       # (N, N), loaded once, reused for all orders
        # Z^{1} = L_hat @ H  with L_hat = (2/lam - 1) I - (2/lam) A_norm
        h = jnp.dot(a, tx0, preferred_element_type=jnp.float32)
        tx1 = (c2 - 1.0) * tx0 - c2 * h
        txs.append(tx1)

    # Z^{k} = 2 L_hat Z^{k-1} - Z^{k-2}  (k static -> unrolled at trace time)
    for _ in range(2, k):
        h = jnp.dot(a, tx1, preferred_element_type=jnp.float32)
        tx2 = (c4 - 2.0) * tx1 - c4 * h - tx0
        txs.append(tx2)
        tx1, tx0 = tx2, tx1

    # Single fused (N, K*Din) @ (K*Din, Dout) MXU contraction instead of K dots.
    tx_all = jnp.concatenate(txs, axis=-1)
    rst = jnp.dot(tx_all, w_ref[...], preferred_element_type=jnp.float32)
    out_ref[...] = (rst + b_ref[...]).astype(out_ref.dtype)


def chebconv_forward(feat, adj, norm, lambda_max, weights, bias):
    """ChebConv forward over a batch of graphs; hot path in a single Pallas kernel."""
    bsz, n, d_in = feat.shape
    k, _, d_out = weights.shape

    # One-time graph preprocessing (outside the K-order recurrence):
    #   fold the symmetric normalization into the adjacency,
    #   compute the exact scalar Chebyshev coefficients.
    a_norm = (adj * norm * jnp.swapaxes(norm, -1, -2)).astype(jnp.float32)   # (B,N,N)
    lam = lambda_max.reshape(bsz, 1).astype(jnp.float32)                     # (B,1)
    coefs = jnp.concatenate([2.0 / lam, 4.0 / lam], axis=-1)                 # (B,2)
    w2d = weights.reshape(k * d_in, d_out).astype(jnp.float32)               # (K*Din,Dout)

    kernel = functools.partial(_chebconv_kernel, k=k)

    grid_spec = pltpu.PrefetchScalarGridSpec(
        num_scalar_prefetch=1,                 # coefs -> SMEM
        grid=(bsz,),
        in_specs=[
            pl.BlockSpec((None, n, d_in), lambda g, c: (g, 0, 0)),   # feat[g]
            pl.BlockSpec((None, n, n), lambda g, c: (g, 0, 0)),      # a_norm[g]
            pl.BlockSpec((k * d_in, d_out), lambda g, c: (0, 0)),    # shared weights
            pl.BlockSpec((1, d_out), lambda g, c: (0, 0)),           # shared bias
        ],
        out_specs=pl.BlockSpec((None, n, d_out), lambda g, c: (g, 0, 0)),
    )

    return pl.pallas_call(
        kernel,
        out_shape=jax.ShapeDtypeStruct((bsz, n, d_out), feat.dtype),
        grid_spec=grid_spec,
        compiler_params=pltpu.CompilerParams(
            dimension_semantics=("parallel",),   # graphs split across TCs on v7x
        ),
    )(coefs, feat, a_norm, w2d, bias)


def chebconv_reference(feat, adj, norm, lambda_max, weights, bias):
    """Plain-JAX single-graph reference mirroring the PyTorch/DGL forward exactly."""
    k = weights.shape[0]
    lam = lambda_max
    tx0 = feat
    rst = tx0 @ weights[0]
    tx1 = tx0
    if k > 1:
        h = (adj @ (tx0 * norm)) * norm
        tx1 = -2.0 * h / lam + tx0 * (2.0 / lam - 1.0)
        rst = rst + tx1 @ weights[1]
    for i in range(2, k):
        h = (adj @ (tx1 * norm)) * norm
        tx2 = -4.0 * h / lam + tx1 * (4.0 / lam - 2.0) - tx0
        rst = rst + tx2 @ weights[i]
        tx1, tx0 = tx2, tx1
    return rst + bias


if __name__ == "__main__":
    key = jax.random.PRNGKey(0)
    B, N, D_IN, D_OUT, K = 2, 64, 32, 32, 3

    k_feat, k_adj, k_w = jax.random.split(key, 3)

    # Node features (B, N, Din).
    feat = jax.random.normal(k_feat, (B, N, D_IN), dtype=jnp.float32)

    # Random dense adjacency per graph, adj[b, dst, src] in {0, 1}; no self loops.
    adj = (jax.random.uniform(k_adj, (B, N, N)) < 0.1).astype(jnp.float32)
    adj = adj * (1.0 - jnp.eye(N, dtype=jnp.float32))

    # norm = in_degrees().clamp(min=1) ** -0.5, shaped (B, N, 1).
    in_deg = jnp.sum(adj, axis=-1)
    norm = jnp.power(jnp.maximum(in_deg, 1.0), -0.5)[..., None].astype(jnp.float32)

    # Per-graph lambda_max passed in explicitly (the module accepts it as an argument).
    # TODO(synk): dgl.laplacian_lambda_max (eigen-solve) has no Pallas equivalent;
    #             lambda_max is supplied as an input instead.
    lambda_max = jnp.array([2.0, 1.8], dtype=jnp.float32)

    # K linear layers, nn.Linear(in, out, bias=False), xavier_normal_ with relu gain.
    gain = jnp.sqrt(2.0)                       # init.calculate_gain('relu')
    std = gain * jnp.sqrt(2.0 / (D_IN + D_OUT))
    # Stored pre-transposed as (K, D_in, D_out) so the transform is x @ W[k].
    weights = std * jax.random.normal(k_w, (K, D_IN, D_OUT), dtype=jnp.float32)
    bias = jnp.zeros((1, D_OUT), dtype=jnp.float32)   # init.zeros_

    out = chebconv_forward(feat, adj, norm, lambda_max, weights, bias)
    out = jax.block_until_ready(out)

    ref = jnp.stack([
        chebconv_reference(feat[b], adj[b], norm[b], lambda_max[b], weights, bias)
        for b in range(B)
    ])

    assert out.shape == (B, N, D_OUT)
    assert jnp.allclose(out, ref, atol=1e-4, rtol=1e-4), "mismatch vs. reference"

    print("KERNEL_OK")
</pallas_src>

<mosaic_0001>
module attributes {stable_mosaic.version = 11 : i64} {
  func.func @_chebconv_kernel(%arg0: i32, %arg1: memref<2x2xf32, #tpu.memory_space<smem>>, %arg2: memref<1x64x32xf32, #tpu.memory_space<vmem>>, %arg3: memref<1x64x64xf32, #tpu.memory_space<vmem>>, %arg4: memref<96x32xf32, #tpu.memory_space<vmem>>, %arg5: memref<1x32xf32, #tpu.memory_space<vmem>>, %arg6: memref<1x64x32xf32, #tpu.memory_space<vmem>>) attributes {dimension_semantics = [#tpu.dimension_semantics<parallel>], iteration_bounds = array<i64: 2>, scalar_prefetch = 1 : i64, scratch_operands = 0 : i64, tpu.core_type = #tpu.core_type<tc>, window_params = [{transform_indices = @transform_0, window_bounds = array<i64: 1, 64, 32>}, {transform_indices = @transform_1, window_bounds = array<i64: 1, 64, 64>}, {pipeline_mode = #tpu.pipeline_mode<synchronous>, transform_indices = @transform_2, window_bounds = array<i64: 96, 32>}, {pipeline_mode = #tpu.pipeline_mode<synchronous>, transform_indices = @transform_3, window_bounds = array<i64: 1, 32>}, {transform_indices = @transform_4, window_bounds = array<i64: 1, 64, 32>}]} {
    %0 = arith.index_cast %arg0 : i32 to index
    %c0 = arith.constant 0 : index
    %1 = memref.load %arg1[%0, %c0] : memref<2x2xf32, #tpu.memory_space<smem>>
    %2 = arith.index_cast %arg0 : i32 to index
    %c1 = arith.constant 1 : index
    %3 = memref.load %arg1[%2, %c1] : memref<2x2xf32, #tpu.memory_space<smem>>
    %c0_0 = arith.constant 0 : index
    %c0_1 = arith.constant 0 : index
    %c0_2 = arith.constant 0 : index
    %4 = vector.load %arg2[%c0_0, %c0_1, %c0_2] : memref<1x64x32xf32, #tpu.memory_space<vmem>>, vector<1x64x32xf32>
    %5 = vector.shape_cast %4 : vector<1x64x32xf32> to vector<64x32xf32>
    %c0_3 = arith.constant 0 : index
    %c0_4 = arith.constant 0 : index
    %c0_5 = arith.constant 0 : index
    %6 = vector.load %arg3[%c0_3, %c0_4, %c0_5] : memref<1x64x64xf32, #tpu.memory_space<vmem>>, vector<1x64x64xf32>
    %7 = vector.shape_cast %6 : vector<1x64x64xf32> to vector<64x64xf32>
    %cst = arith.constant dense<0.000000e+00> : vector<64x32xf32>
    %8 = tpu.matmul %7, %5, %cst {dimension_numbers = #tpu.dot_dimension_numbers<[1], [0], [0], [1], [0, 0, 1, 1], [], []>} : vector<64x64xf32>, vector<64x32xf32>, vector<64x32xf32> -> vector<64x32xf32>
    %cst_6 = arith.constant 1.000000e+00 : f32
    %9 = arith.subf %1, %cst_6 : f32
    %10 = vector.broadcast %9 : f32 to vector<64x32xf32>
    %11 = arith.mulf %10, %5 : vector<64x32xf32>
    %12 = vector.broadcast %1 : f32 to vector<64x32xf32>
    %13 = arith.mulf %12, %8 : vector<64x32xf32>
    %14 = arith.subf %11, %13 : vector<64x32xf32>
    %cst_7 = arith.constant dense<0.000000e+00> : vector<64x32xf32>
    %15 = tpu.matmul %7, %14, %cst_7 {dimension_numbers = #tpu.dot_dimension_numbers<[1], [0], [0], [1], [0, 0, 1, 1], [], []>} : vector<64x64xf32>, vector<64x32xf32>, vector<64x32xf32> -> vector<64x32xf32>
    %cst_8 = arith.constant 2.000000e+00 : f32
    %16 = arith.subf %3, %cst_8 : f32
    %17 = vector.broadcast %16 : f32 to vector<64x32xf32>
    %18 = arith.mulf %17, %14 : vector<64x32xf32>
    %19 = vector.broadcast %3 : f32 to vector<64x32xf32>
    %20 = arith.mulf %19, %15 : vector<64x32xf32>
    %21 = arith.subf %18, %20 : vector<64x32xf32>
    %22 = arith.subf %21, %5 : vector<64x32xf32>
    %23 = tpu.concatenate %5, %14, %22 in 1 : vector<64x32xf32>, vector<64x32xf32>, vector<64x32xf32> -> vector<64x96xf32>
    %c0_9 = arith.constant 0 : index
    %c0_10 = arith.constant 0 : index
    %24 = vector.load %arg4[%c0_9, %c0_10] : memref<96x32xf32, #tpu.memory_space<vmem>>, vector<96x32xf32>
    %cst_11 = arith.constant dense<0.000000e+00> : vector<64x32xf32>
    %25 = tpu.matmul %23, %24, %cst_11 {dimension_numbers = #tpu.dot_dimension_numbers<[1], [0], [0], [1], [0, 0, 1, 1], [], []>} : vector<64x96xf32>, vector<96x32xf32>, vector<64x32xf32> -> vector<64x32xf32>
    %c0_12 = arith.constant 0 : index
    %c0_13 = arith.constant 0 : index
    %26 = vector.load %arg5[%c0_12, %c0_13] : memref<1x32xf32, #tpu.memory_space<vmem>>, vector<1x32xf32>
    %27 = vector.broadcast %26 : vector<1x32xf32> to vector<64x32xf32>
    %28 = arith.addf %25, %27 : vector<64x32xf32>
    %c0_14 = arith.constant 0 : index
    %c0_15 = arith.constant 0 : index
    %c0_16 = arith.constant 0 : index
    %29 = vector.load %arg6[%c0_14, %c0_15, %c0_16] : memref<1x64x32xf32, #tpu.memory_space<vmem>>, vector<1x64x32xf32>
    %30 = vector.shape_cast %29 : vector<1x64x32xf32> to vector<64x32xf32>
    %31 = vector.shape_cast %28 : vector<64x32xf32> to vector<1x64x32xf32>
    tpu.vector_store %arg6[%c0_14, %c0_15, %c0_16], %31 {strides = array<i32>} : memref<1x64x32xf32, #tpu.memory_space<vmem>>, vector<1x64x32xf32>,
    return
  }
  func.func @transform_0(%arg0: i32, %arg1: memref<2x2xf32, #tpu.memory_space<smem>>) -> (i32, i32, i32) {
    %c0_i32 = arith.constant 0 : i32
    %c0_i32_0 = arith.constant 0 : i32
    %c0_i32_1 = arith.constant 0 : i32
    return %arg0, %c0_i32, %c0_i32_0 : i32, i32, i32
  }
  func.func @transform_1(%arg0: i32, %arg1: memref<2x2xf32, #tpu.memory_space<smem>>) -> (i32, i32, i32) {
    %c0_i32 = arith.constant 0 : i32
    %c0_i32_0 = arith.constant 0 : i32
    %c0_i32_1 = arith.constant 0 : i32
    return %arg0, %c0_i32, %c0_i32_0 : i32, i32, i32
  }
  func.func @transform_2(%arg0: i32, %arg1: memref<2x2xf32, #tpu.memory_space<smem>>) -> (i32, i32) {
    %c0_i32 = arith.constant 0 : i32
    %c0_i32_0 = arith.constant 0 : i32
    %c0_i32_1 = arith.constant 0 : i32
    return %c0_i32, %c0_i32_0 : i32, i32
  }
  func.func @transform_3(%arg0: i32, %arg1: memref<2x2xf32, #tpu.memory_space<smem>>) -> (i32, i32) {
    %c0_i32 = arith.constant 0 : i32
    %c0_i32_0 = arith.constant 0 : i32
    %c0_i32_1 = arith.constant 0 : i32
    return %c0_i32, %c0_i32_0 : i32, i32
  }
  func.func @transform_4(%arg0: i32, %arg1: memref<2x2xf32, #tpu.memory_space<smem>>) -> (i32, i32, i32) {
    %c0_i32 = arith.constant 0 : i32
    %c0_i32_0 = arith.constant 0 : i32
    %c0_i32_1 = arith.constant 0 : i32
    return %arg0, %c0_i32, %c0_i32_0 : i32, i32, i32
  }
}

</mosaic_0001>

<bundles_post_ra>
// kernel: tpu_custom_call.1
= control target key start
LH: loop header
LB: loop body
LE: loop exit
PB: predicated region body
PF: predicated region fallthrough
CT: control target
= control target key end

     0   :  { %s743_s21 = smov [#allocation3]   ;;  %s1031_s0 = inlined_call_operand.vmem [shape: f32[2,2], index: 0, kind: input, shape index: {}]   ;;  %s1032_s1 = inlined_call_operand.vmem [shape: f32[2,64,32], index: 1, kind: input, shape index: {}]   ;;  %s1033_s2 = inlined_call_operand.vmem [shape: f32[2,64,64], index: 2, kind: input, shape index: {}]   ;;  %s1034_s3 = inlined_call_operand.vmem [shape: f32[96,32], index: 3, kind: input, shape index: {}]   ;;  %s1035_s4 = inlined_call_operand.vmem [shape: f32[1,32], index: 4, kind: input, shape index: {}]   ;;  %s1036_s5 = inlined_call_operand.vmem [shape: f32[2,64,32], index: 5, kind: output, shape index: {}]  }
   0x1   :  { %s11_s20 = sshll.u32 %s1031_s0, 4  ;;  %s12_s20 = int_to_ptr.vmem [resolvable:$true] %s11_s20 }
   0x2   :  { %14 = dma.vmem_to_smem %s12_s20, 32, %s743_s21, [#allocation2] }
   0x3   :  { %737 = dma.done.wait [#allocation2], 32 }
   0x4   :  { %738 = vsyncadd [#allocation2], 4294967264 }
   0x5   :  { %17 = sfence }
   0x6   :  { %s779_s22 = smov 0  }
   0x7 LB: > { %s785_s23 = sadd.s32 4294967295, %s741_s22   ;;  %p658_p0 = scmp.ge.s32.totalorder %s741_s22, 1  ;;  %s741_s22 = sphi %s779_s22, %s23_s22  }
   0x8   : > { %p181_p1 = scmp.lt.s32.totalorder %s741_s22, 3 }
   0xa   : > { %p182_p2 = pnand %p658_p0, %p181_p1 }
   0xb   : > { %p212_p3 = scmp.lt.s32.totalorder (!%p182_p2), %s785_s23, 1  ;;  %s665_s6 = sshll.u32 (!%p182_p2), %s785_s23, 7 }
   0xc   : > { %185 = sbr.rel (%p182_p2) target bundleno = 677 (0x2a5), region = 36  ;;  %s228_s7 = sld [smem:[#allocation3 + %s665_s6]] (!%p182_p2) }
   0xd   : > { %s229_s9 = sadd.s32 (!%p182_p2), 1, %s665_s6  ;;  %s744_s11 = smov (!%p182_p2), 32  }
   0xe   : > { %s859_s10 = sld [smem:[#allocation3 + %s229_s9]] (!%p182_p2)  ;;  %s745_s13 = smov (!%p182_p2), 64  }
  0x11   : > { %s213_s0 = scalar_select %p212_p3, %s785_s23, 1  ;;  %vm247_vm0 = vcmask 523264   ;;  %vm480_vm1 = vcmask 261120   ;;  %vm513_vm2 = vcmask 785408  }
  0x12   : > { %s674_s8 = sadd.f32 -1.0, %s228_s7  ;;  %v323_v17 = vstv %s228_s7 }
  0x13   : > { %s791_s24 = sshll.u32 %s213_s0, 6 }
  0x14   : > { %s216_s27 = scalar_lea.vmem %s1032_s1, %s791_s24  ;;  %s221_s30 = scalar_lea.vmem %s1033_s2, %s791_s24  ;;  %v314_v16 = vstv %s674_s8  ;;  %v902_v53 = vstv %s859_s10 }
  0x15   : > { %v797_v0 = vld [vmem:[%s216_s27 + $0x38] sm:$0xff]  ;;  %v799_v1 = vld [vmem:[%s216_s27 + $0x30] sm:$0xff]  ;;  %v802_v2 = vld [vmem:[%s216_s27 + $0x28] sm:$0xff]  ;;  %s683_s12 = sadd.f32 -2.0, %s859_s10  ;;  %s226_s18 = scalar_lea.vmem %s1036_s5, %s791_s24 }
  0x16   : > { %280 = vmatpush.msra.mxu0 %v797_v0  ;;  %v805_v3 = vld [vmem:[%s216_s27 + $0x20] sm:$0xff]  ;;  %v808_v4 = vld [vmem:[%s216_s27 + $0x18] sm:$0xff]  ;;  %v811_v5 = vld [vmem:[%s216_s27 + $0x10] sm:$0xff]  ;;  %v322_v40 = vmul.f32 %v314_v16, %v797_v0  ;;  %v321_v42 = vmul.f32 %v314_v16, %v799_v1  ;;  %v320_v45 = vmul.f32 %v314_v16, %v802_v2 }
  0x17   : > { %v814_v6 = vld [vmem:[%s216_s27 + $0x8] sm:$0xff]  ;;  %v821_v7 = vld [vmem:[%s216_s27] sm:$0xff]  ;;  %v833_v10 = vld [vmem:[%s221_s30 + $0x10] sm:$0xff]  ;;  %v864_v26 = vstv %s683_s12  ;;  %v317_v28 = vmul.f32 %v314_v16, %v811_v5  ;;  %v318_v33 = vmul.f32 %v314_v16, %v808_v4  ;;  %v319_v48 = vmul.f32 %v314_v16, %v805_v3 }
  0x18   : > { %281 = vmatpush.msra.mxu0 %v799_v1  ;;  %v824_v8 = vld [vmem:[%s221_s30] sm:$0xff]  ;;  %v829_v9 = vld [vmem:[%s221_s30 + $0x8] sm:$0xff]  ;;  %v837_v11 = vld [vmem:[%s221_s30 + $0x18] sm:$0xff]  ;;  %v315_v18 = vmul.f32 %v314_v16, %v821_v7  ;;  %v316_v22 = vmul.f32 %v314_v16, %v814_v6 }
  0x19   : > { %v841_v12 = vld [vmem:[%s221_s30 + $0x20] sm:$0xff]  ;;  %v845_v13 = vld [vmem:[%s221_s30 + $0x28] sm:$0xff]  ;;  %v849_v14 = vld [vmem:[%s221_s30 + $0x30] sm:$0xff] }
  0x1a   : > { %282 = vmatpush.msra.mxu0 %v802_v2  ;;  %v853_v15 = vld [vmem:[%s221_s30 + $0x38] sm:$0xff] }
  0x1b   : > { %v508_v16 = vld [vmem:[%s1034_s3 + $0x58] sm:$0xff] }
  0x1c   : > { %283 = vmatpush.msra.mxu0 %v805_v3  ;;  %542 = vmatpush.msra.mxu2 %v508_v16 }
  0x1d   : > { %697 = vmatpush.msra.mxu3 %v508_v16 }
  0x1e   : > { %284 = vmatpush.msra.mxu0 %v808_v4 }
  0x20   : > { %285 = vmatpush.msra.mxu0 %v811_v5 }
  0x22   : > { %286 = vmatpush.msra.mxu0 %v814_v6 }
  0x24   : > { %287 = vmatpush.msra.mxu0 %v821_v7 }
  0x25   : > { %666 = vmatmul.msk.f32.vlgmr.msra.gmra.mxu0 %vm247_vm0, %v824_v8 }
  0x2d   : > { %667 = vmatmul.msk.f32.gmra.mxu0 %vm247_vm0, %v829_v9 }
  0x35   : > { %668 = vmatmul.msk.f32.gmra.mxu0 %vm247_vm0, %v833_v10 }
  0x3d   : > { %669 = vmatmul.msk.f32.gmra.mxu0 %vm247_vm0, %v837_v11 }
  0x45   : > { %670 = vmatmul.msk.f32.gmra.mxu0 %vm247_vm0, %v841_v12 }
  0x4d   : > { %671 = vmatmul.msk.f32.gmra.mxu0 %vm247_vm0, %v845_v13 }
  0x55   : > { %672 = vmatmul.msk.f32.gmra.mxu0 %vm247_vm0, %v849_v14 }
  0x5d   : > { %673 = vmatmul.msk.f32.gmra.mxu0 %vm247_vm0, %v853_v15 }
  0xa2   : > { %v289_v19 = vpop.f32.mrf.mxu0 }
  0xa3   : > { %v324_v20 = vmul.f32 %v323_v17, %v289_v19 }
  0xa5   : > { %v332_v21 = vsub.f32 %v315_v18, %v324_v20 }
  0xa7   : > { %424 = vrot.lane.b32.xlu0 %v332_v21, %s744_s11  ;;  %v383_v55 = vmul.f32 %v864_v26, %v332_v21 }
  0xaa   : > { %v292_v23 = vpop.f32.mrf.mxu0 }
  0xab   : > { %v325_v24 = vmul.f32 %v323_v17, %v292_v23  ;;  %v505_v23 = vld [vmem:[%s1034_s3 + $0x40] sm:$0xff] }
  0xad   : > { %v333_v25 = vsub.f32 %v316_v22, %v325_v24 }
  0xaf   : > { %426 = vrot.lane.b32.xlu1 %v333_v25, %s744_s11  ;;  %v384_v27 = vmul.f32 %v864_v26, %v333_v25 }
  0xb2   : > { %v295_v29 = vpop.f32.mrf.mxu0 }
  0xb3   : > { %v326_v30 = vmul.f32 %v323_v17, %v295_v29  ;;  %v502_v29 = vld [vmem:[%s1034_s3 + $0x28] sm:$0xff] }
  0xb5   : > { %v334_v31 = vsub.f32 %v317_v28, %v326_v30 }
  0xb7   : > { %428 = vrot.lane.b32.xlu2 %v334_v31, %s744_s11  ;;  %v385_v32 = vmul.f32 %v864_v26, %v334_v31 }
  0xba   : > { %v298_v34 = vpop.f32.mrf.mxu0 }
  0xbb   : > { %v327_v35 = vmul.f32 %v323_v17, %v298_v34 }
  0xbd   : > { %v335_v36 = vsub.f32 %v318_v33, %v327_v35 }
  0xc2   : > { %v301_v37 = vpop.f32.mrf.mxu0 }
  0xc3   : > { %v328_v49 = vmul.f32 %v323_v17, %v301_v37 }
  0xc5   : > { %v336_v52 = vsub.f32 %v319_v48, %v328_v49 }
  0xc7   : > { %v387_v19 = vmul.f32 %v864_v26, %v336_v52 }
  0xca   : > { %v304_v38 = vpop.f32.mrf.mxu0 }
  0xcb   : > { %v329_v46 = vmul.f32 %v323_v17, %v304_v38 }
  0xcd   : > { %v881_v51 = vsub.f32 %v320_v45, %v329_v46  ;;  %v500_v45 = vld [vmem:[%s1034_s3 + $0x18] sm:$0xff]  ;;  %v498_v46 = vld [vmem:[%s1034_s3 + $0x8] sm:$0xff] }
  0xd2   : > { %v307_v39 = vpop.f32.mrf.mxu0 }
  0xd3   : > { %v330_v43 = vmul.f32 %v323_v17, %v307_v39 }
  0xd5   : > { %v878_v50 = vsub.f32 %v321_v42, %v330_v43 }
  0xda   : > { %v310_v41 = vpop.f32.mrf.mxu0 }
  0xdb   : > { %v331_v44 = vmul.f32 %v323_v17, %v310_v41  ;;  %v507_v17 = vld [vmem:[%s1034_s3 + $0x50] sm:$0xff] }
  0xdc   : > { %543 = vmatpush.msra.mxu2 %v507_v17  ;;  %698 = vmatpush.msra.mxu3 %v507_v17 }
  0xdd   : > { %v875_v47 = vsub.f32 %v322_v40, %v331_v44  ;;  %v501_v44 = vld [vmem:[%s1034_s3 + $0x20] sm:$0xff] }
  0xdf   : > { %348 = vmatpush.msra.mxu1 %v875_v47  ;;  %v390_v39 = vmul.f32 %v864_v26, %v875_v47 }
  0xe1   : > { %349 = vmatpush.msra.mxu1 %v878_v50 }
  0xe3   : > { %350 = vmatpush.msra.mxu1 %v881_v51 }
  0xe5   : > { %351 = vmatpush.msra.mxu1 %v336_v52 }
  0xe7   : > { %352 = vmatpush.msra.mxu1 %v335_v36 }
  0xe9   : > { %353 = vmatpush.msra.mxu1 %v334_v31  ;;  %v389_v31 = vmul.f32 %v864_v26, %v878_v50 }
  0xeb   : > { %354 = vmatpush.msra.mxu1 %v333_v25  ;;  %v504_v25 = vld [vmem:[%s1034_s3 + $0x38] sm:$0xff] }
  0xed   : > { %355 = vmatpush.msra.mxu1 %v332_v21  ;;  %v506_v21 = vld [vmem:[%s1034_s3 + $0x48] sm:$0xff] }
  0xee   : > { %675 = vmatmul.msk.f32.vlgmr.msra.gmra.mxu1 %vm247_vm0, %v824_v8  ;;  %544 = vmatpush.msra.mxu2 %v506_v21 }
  0xef   : > { %699 = vmatpush.msra.mxu3 %v506_v21 }
  0xf0   : > { %545 = vmatpush.msra.mxu2 %v505_v23 }
  0xf1   : > { %700 = vmatpush.msra.mxu3 %v505_v23 }
  0xf2   : > { %546 = vmatpush.msra.mxu2 %v504_v25 }
  0xf3   : > { %701 = vmatpush.msra.mxu3 %v504_v25 }
  0xf6   : > { %676 = vmatmul.msk.f32.gmra.mxu1 %vm247_vm0, %v829_v9 }
  0xfe   : > { %677 = vmatmul.msk.f32.gmra.mxu1 %vm247_vm0, %v833_v10 }
 0x106   : > { %678 = vmatmul.msk.f32.gmra.mxu1 %vm247_vm0, %v837_v11 }
 0x10e   : > { %679 = vmatmul.msk.f32.gmra.mxu1 %vm247_vm0, %v841_v12  ;;  %v386_v12 = vmul.f32 %v864_v26, %v335_v36 }
 0x111   : > { %v429_v49 = vpop.permute.xlu2 %428 }
 0x116   : > { %680 = vmatmul.msk.f32.gmra.mxu1 %vm247_vm0, %v845_v13 }
 0x119   : > { %v425_v48 = vpop.permute.xlu0 %424 }
 0x11e   : > { %681 = vmatmul.msk.f32.gmra.mxu1 %vm247_vm0, %v849_v14 }
 0x126   : > { %682 = vmatmul.msk.f32.gmra.mxu1 %vm247_vm0, %v853_v15 }
 0x16b   : > { %v357_v54 = vpop.f32.mrf.mxu1 }
 0x16c   : > { %v392_v56 = vmul.f32 %v902_v53, %v357_v54 }
 0x16e   : > { %v400_v57 = vsub.f32 %v383_v55, %v392_v56 }
 0x170   : > { %v408_v58 = vsub.f32 %v400_v57, %v821_v7 }
 0x172   : > { %456 = vrot.lane.b32.xlu0 %v408_v58, %s745_s13 }
 0x173   : > { %v360_v59 = vpop.f32.mrf.mxu1 }
 0x174   : > { %v393_v60 = vmul.f32 %v902_v53, %v360_v59  ;;  %v483_v59 = vsel %vm480_vm1, %v811_v5, %v429_v49 }
 0x176   : > { %v401_v61 = vsub.f32 %v384_v27, %v393_v60  ;;  %v503_v27 = vld [vmem:[%s1034_s3 + $0x30] sm:$0xff] }
 0x177   : > { %547 = vmatpush.msra.mxu2 %v503_v27  ;;  %702 = vmatpush.msra.mxu3 %v503_v27 }
 0x178   : > { %v409_v62 = vsub.f32 %v401_v61, %v814_v6 }
 0x179   : > { %548 = vmatpush.msra.mxu2 %v502_v29  ;;  %703 = vmatpush.msra.mxu3 %v502_v29 }
 0x17a   : > { %430 = vrot.lane.b32.xlu0 %v335_v36, %s744_s11  ;;  %458 = vrot.lane.b32.xlu1 %v409_v62, %s745_s13  ;;  %v388_v36 = vmul.f32 %v864_v26, %v881_v51  ;;  %v499_v26 = vld [vmem:[%s1034_s3 + $0x10] sm:$0xff] }
 0x17b   : > { %v363_v63 = vpop.f32.mrf.mxu1  ;;  %549 = vmatpush.msra.mxu2 %v501_v44  ;;  %704 = vmatpush.msra.mxu3 %v501_v44 }
 0x17c   : > { %v394_v8 = vmul.f32 %v902_v53, %v363_v63 }
 0x17d   : > { %550 = vmatpush.msra.mxu2 %v500_v45  ;;  %705 = vmatpush.msra.mxu3 %v500_v45 }
 0x17e   : > { %v402_v9 = vsub.f32 %v385_v32, %v394_v8 }
 0x17f   : > { %551 = vmatpush.msra.mxu2 %v499_v26  ;;  %706 = vmatpush.msra.mxu3 %v499_v26 }
 0x180   : > { %v410_v10 = vsub.f32 %v402_v9, %v811_v5 }
 0x181   : > { %552 = vmatpush.msra.mxu2 %v498_v46  ;;  %707 = vmatpush.msra.mxu3 %v498_v46 }
 0x182   : > { %436 = vrot.lane.b32.xlu0 %v878_v50, %s744_s11  ;;  %460 = vrot.lane.b32.xlu2 %v410_v10, %s745_s13  ;;  %v481_v50 = vsel %vm480_vm1, %v821_v7, %v425_v48 }
 0x183   : > { %v366_v11 = vpop.f32.mrf.mxu1 }
 0x184   : > { %v395_v13 = vmul.f32 %v902_v53, %v366_v11 }
 0x186   : > { %v403_v14 = vsub.f32 %v386_v12, %v395_v13 }
 0x188   : > { %v411_v15 = vsub.f32 %v403_v14, %v808_v4 }
 0x18a   : > { %434 = vrot.lane.b32.xlu0 %v881_v51, %s744_s11  ;;  %432 = vrot.lane.b32.xlu2 %v336_v52, %s744_s11  ;;  %v427_v51 = vpop.permute.xlu1 %426 }
 0x18b   : > { %462 = vrot.lane.b32.xlu1 %v411_v15, %s745_s13  ;;  %v369_v18 = vpop.f32.mrf.mxu1  ;;  %v482_v55 = vsel %vm480_vm1, %v814_v6, %v427_v51 }
 0x18c   : > { %v396_v20 = vmul.f32 %v902_v53, %v369_v18  ;;  %v720_v18 = vld [vmem:[%s1035_s4] ss:$0 sm:$0xff] }
 0x18e   : > { %v404_v22 = vsub.f32 %v387_v19, %v396_v20 }
 0x190   : > { %v412_v24 = vsub.f32 %v404_v22, %v805_v3 }
 0x193   : > { %464 = vrot.lane.b32.xlu1 %v412_v24, %s745_s13  ;;  %v372_v28 = vpop.f32.mrf.mxu1 }
 0x194   : > { %v397_v34 = vmul.f32 %v902_v53, %v372_v28 }
 0x196   : > { %v405_v38 = vsub.f32 %v388_v36, %v397_v34 }
 0x198   : > { %v413_v42 = vsub.f32 %v405_v38, %v802_v2 }
 0x19b   : > { %438 = vrot.lane.b32.xlu1 %v875_v47, %s744_s11  ;;  %v375_v30 = vpop.f32.mrf.mxu1  ;;  %v497_v47 = vld [vmem:[%s1034_s3] sm:$0xff] }
 0x19c   : > { %v398_v32 = vmul.f32 %v902_v53, %v375_v30  ;;  %553 = vmatpush.msra.mxu2 %v497_v47  ;;  %708 = vmatpush.msra.mxu3 %v497_v47 }
 0x19e   : > { %v406_v33 = vsub.f32 %v389_v31, %v398_v32 }
 0x1a0   : > { %v414_v35 = vsub.f32 %v406_v33, %v799_v1 }
 0x1a2   : > { %468 = vrot.lane.b32.xlu2 %v414_v35, %s745_s13 }
 0x1a3   : > { %v378_v37 = vpop.f32.mrf.mxu1 }
 0x1a4   : > { %v399_v40 = vmul.f32 %v902_v53, %v378_v37 }
 0x1a6   : > { %v407_v41 = vsub.f32 %v390_v39, %v399_v40 }
 0x1a8   : > { %v415_v43 = vsub.f32 %v407_v41, %v797_v0 }
 0x1aa   : > { %466 = vrot.lane.b32.xlu2 %v413_v42, %s745_s13  ;;  %470 = vrot.lane.b32.xlu0 %v415_v43, %s745_s13 }
 0x1dc   : > { %v461_v54 = vpop.permute.xlu2 %460 }
 0x1dd   : > { %v491_v60 = vsel %vm247_vm0, %v483_v59, %v461_v54 }
 0x1e4   : > { %v457_v52 = vpop.permute.xlu0 %456  ;;  %v433_v7 = vpop.permute.xlu2 %432 }
 0x1e5   : > { %v489_v53 = vsel %vm247_vm0, %v481_v50, %v457_v52  ;;  %v485_v5 = vsel %vm480_vm1, %v805_v3, %v433_v7 }
 0x1e6   : > { %684 = vmatmul.msk.f32.vlgmr.msra.gmra.mxu2 %vm513_vm2, %v489_v53 }
 0x1ec   : > { %v459_v56 = vpop.permute.xlu1 %458  ;;  %v431_v58 = vpop.permute.xlu0 %430 }
 0x1ed   : > { %v490_v57 = vsel %vm247_vm0, %v482_v55, %v459_v56  ;;  %v484_v6 = vsel %vm480_vm1, %v808_v4, %v431_v58 }
 0x1ee   : > { %685 = vmatmul.msk.f32.gmra.mxu2 %vm513_vm2, %v490_v57 }
 0x1f4   : > { %v437_v61 = vpop.permute.xlu0 %436 }
 0x1f5   : > { %v487_v62 = vsel %vm480_vm1, %v799_v1, %v437_v61 }
 0x1f6   : > { %686 = vmatmul.msk.f32.gmra.mxu2 %vm513_vm2, %v491_v60 }
 0x1fc   : > { %v469_v63 = vpop.permute.xlu2 %468  ;;  %v435_v12 = vpop.permute.xlu0 %434 }
 0x1fd   : > { %v463_v8 = vpop.permute.xlu1 %462  ;;  %v495_v9 = vsel %vm247_vm0, %v487_v62, %v469_v63  ;;  %v486_v13 = vsel %vm480_vm1, %v802_v2, %v435_v12 }
 0x1fe   : > { %v492_v10 = vsel %vm247_vm0, %v484_v6, %v463_v8  ;;  %690 = vmatmul.msk.f32.vlgmr.msra.gmra.mxu3 %vm513_vm2, %v495_v9 }
 0x1ff   : > { %687 = vmatmul.msk.f32.gmra.mxu2 %vm513_vm2, %v492_v10 }
 0x204   : > { %v467_v4 = vpop.permute.xlu2 %466 }
 0x205   : > { %v465_v11 = vpop.permute.xlu1 %464  ;;  %v494_v14 = vsel %vm247_vm0, %v486_v13, %v467_v4 }
 0x206   : > { %v493_v1 = vsel %vm247_vm0, %v485_v5, %v465_v11 }
 0x207   : > { %688 = vmatmul.msk.f32.gmra.mxu2 %vm513_vm2, %v493_v1 }
 0x20d   : > { %v439_v15 = vpop.permute.xlu1 %438 }
 0x20e   : > { %v488_v16 = vsel %vm480_vm1, %v797_v0, %v439_v15 }
 0x20f   : > { %689 = vmatmul.msk.f32.gmra.mxu2 %vm513_vm2, %v494_v14 }
 0x21c   : > { %v471_v17 = vpop.permute.xlu0 %470 }
 0x21d   : > { %v496_v3 = vsel %vm247_vm0, %v488_v16, %v471_v17 }
 0x21e   : > { %691 = vmatmul.msk.f32.gmra.mxu3 %vm513_vm2, %v496_v3 }
 0x269   : > { %v555_v2 = vpop.f32.mrf.mxu2 }
 0x26a   : > { %v556_v19 = vadd.f32 %v720_v18, %v555_v2 }
 0x26c   : > { %579 = vst.msk [vmem:[%s226_s18] sm:$0xff] %vm480_vm1, %v556_v19 }
 0x271   : > { %v558_v20 = vpop.f32.mrf.mxu2 }
 0x272   : > { %v559_v21 = vadd.f32 %v720_v18, %v558_v20 }
 0x274   : > { %580 = vst.msk [vmem:[%s226_s18 + $0x8] sm:$0xff] %vm480_vm1, %v559_v21 }
 0x279   : > { %v561_v0 = vpop.f32.mrf.mxu2 }
 0x27a   : > { %v562_v22 = vadd.f32 %v720_v18, %v561_v0 }
 0x27c   : > { %581 = vst.msk [vmem:[%s226_s18 + $0x10] sm:$0xff] %vm480_vm1, %v562_v22 }
 0x281   : > { %v573_v23 = vpop.f32.mrf.mxu3 }
 0x282   : > { %v564_v24 = vpop.f32.mrf.mxu2  ;;  %v574_v25 = vadd.f32 %v720_v18, %v573_v23 }
 0x283   : > { %v565_v27 = vadd.f32 %v720_v18, %v564_v24 }
 0x284   : > { %585 = vst.msk [vmem:[%s226_s18 + $0x30] sm:$0xff] %vm480_vm1, %v574_v25 }
 0x285   : > { %582 = vst.msk [vmem:[%s226_s18 + $0x18] sm:$0xff] %vm480_vm1, %v565_v27 }
 0x28a   : > { %v567_v28 = vpop.f32.mrf.mxu2 }
 0x28b   : > { %v568_v29 = vadd.f32 %v720_v18, %v567_v28 }
 0x28d   : > { %583 = vst.msk [vmem:[%s226_s18 + $0x20] sm:$0xff] %vm480_vm1, %v568_v29 }
 0x292   : > { %v570_v30 = vpop.f32.mrf.mxu2 }
 0x293   : > { %v571_v31 = vadd.f32 %v720_v18, %v570_v30 }
 0x295   : > { %584 = vst.msk [vmem:[%s226_s18 + $0x28] sm:$0xff] %vm480_vm1, %v571_v31 }
 0x2a1   : > { %v576_v32 = vpop.f32.mrf.mxu3 }
 0x2a2   : > { %v577_v33 = vadd.f32 %v720_v18, %v576_v32 }
 0x2a4   : > { %586 = vst.msk [vmem:[%s226_s18 + $0x38] sm:$0xff] %vm480_vm1, %v577_v33 }
 0x2a5 PF: > { %s23_s22 = sadd.s32 1, %s741_s22  }
 0x2a6   : > { %p20_p4 = scmp.ge.s32.totalorder %s23_s22, 4  }
 0x2a8   :  { %22 = sbr.rel (!%p20_p4) target bundleno = 7 (0x7), region = 69 }

</bundles_post_ra>
